<compile_context>
chip_gen: v6e
topology: v6e:2x2x1
jax: 0.10.0
libtpu: 0.0.40
codegen_flags: <defaults>
</compile_context>

<pallas_src>
import functools

import jax
import jax.numpy as jnp
from jax.experimental import pallas as pl
from jax.experimental.pallas import tpu as pltpu

_EPS = 1e-5


def _make_fused_mlp_kernel(num_hidden, matmul_dtype):
    """Builds a kernel that runs the whole MLP on one VMEM-resident block.

    Ref order: x, (w, b, gamma, beta) * num_hidden, w_last, b_last, out.
    The Python loop unrolls at trace time (num_hidden is static).
    """

    def kernel(*refs):
        x_ref = refs[0]
        o_ref = refs[-1]
        x = x_ref[...].astype(jnp.float32)

        idx = 1
        for _ in range(num_hidden):
            w_ref, b_ref, g_ref, be_ref = refs[idx], refs[idx + 1], refs[idx + 2], refs[idx + 3]
            idx += 4
            # Linear: [N, Cin] @ [Cin, Cout] + [1, Cout]   (bf16 MXU operands,
            # f32 accumulation; elementwise stays f32 for v5e compatibility).
            y = jnp.dot(
                x.astype(matmul_dtype),
                w_ref[...].astype(matmul_dtype),
                preferred_element_type=jnp.float32,
            )
            y = y + b_ref[...]
            # BatchNorm1d (training mode, biased batch stats over N axis),
            # folded into a single per-channel scale/shift (one FMA per elem).
            mu = jnp.mean(y, axis=0, keepdims=True)
            var = jnp.maximum(jnp.mean(y * y, axis=0, keepdims=True) - mu * mu, 0.0)
            scale = g_ref[...] * jax.lax.rsqrt(var + _EPS)
            shift = be_ref[...] - mu * scale
            # ReLU (act_first=False -> activation after norm); dropout p=0.
            x = jnp.maximum(y * scale + shift, 0.0)

        # plain_last=True: final layer is linear only (dropout[-1] = 0).
        w_ref, b_ref = refs[idx], refs[idx + 1]
        y = jnp.dot(
            x.astype(matmul_dtype),
            w_ref[...].astype(matmul_dtype),
            preferred_element_type=jnp.float32,
        )
        o_ref[...] = (y + b_ref[...]).astype(o_ref.dtype)

    return kernel


@functools.partial(jax.jit, static_argnames=("matmul_dtype",))
def mlp_forward(x, params, matmul_dtype=jnp.bfloat16):
    """Fused MLP forward: one pallas_call for the whole network."""
    num_hidden = len(params) - 1
    flat_inputs = [x]
    for layer in params[:-1]:
        flat_inputs.extend(layer)          # w, b, gamma, beta
    flat_inputs.extend(params[-1])          # w_last, b_last

    n = x.shape[0]
    c_out = params[-1][0].shape[1]

    kernel = _make_fused_mlp_kernel(num_hidden, matmul_dtype)
    vmem_spec = lambda: pl.BlockSpec(memory_space=pltpu.MemorySpace.VMEM)

    return pl.pallas_call(
        kernel,
        out_shape=jax.ShapeDtypeStruct((n, c_out), x.dtype),
        in_specs=[vmem_spec() for _ in flat_inputs],
        out_specs=vmem_spec(),
    )(*flat_inputs)


def init_mlp_params(key, channel_list):
    """Deterministic parameter init (Linear weights/biases + BN affine).

    Weights are stored transposed as [Cin, Cout]; biases/gamma/beta as
    [1, Cout] so the kernel broadcasts along lanes without reshapes.
    """
    params = []
    n_layers = len(channel_list) - 1
    for i, (c_in, c_out) in enumerate(zip(channel_list[:-1], channel_list[1:])):
        key, wk, bk = jax.random.split(key, 3)
        bound = 1.0 / jnp.sqrt(c_in)
        w = jax.random.uniform(wk, (c_in, c_out), jnp.float32, -bound, bound)
        b = jax.random.uniform(bk, (1, c_out), jnp.float32, -bound, bound)
        if i < n_layers - 1:
            gamma = jnp.ones((1, c_out), jnp.float32)   # BN reset: weight = 1
            beta = jnp.zeros((1, c_out), jnp.float32)   # BN reset: bias = 0
            params.append((w, b, gamma, beta))
        else:
            params.append((w, b))
    return params


def mlp_reference(x, params, matmul_dtype=jnp.float32):
    """Pure-JAX reference (same math / cast policy, no Pallas)."""
    x = x.astype(jnp.float32)
    for (w, b, gamma, beta) in params[:-1]:
        y = jnp.dot(
            x.astype(matmul_dtype), w.astype(matmul_dtype),
            preferred_element_type=jnp.float32,
        ) + b
        mu = jnp.mean(y, axis=0, keepdims=True)
        var = jnp.maximum(jnp.mean(y * y, axis=0, keepdims=True) - mu * mu, 0.0)
        scale = gamma * jax.lax.rsqrt(var + _EPS)
        shift = beta - mu * scale
        x = jnp.maximum(y * scale + shift, 0.0)
    w, b = params[-1]
    return jnp.dot(
        x.astype(matmul_dtype), w.astype(matmul_dtype),
        preferred_element_type=jnp.float32,
    ) + b


if __name__ == "__main__":
    key = jax.random.PRNGKey(0)
    channel_list = [16, 32, 32, 64]   # 3-layer MLP, like MLP([16, 32, 32, 64])
    n = 8                             # number of samples / nodes

    key, xk, pk = jax.random.split(key, 3)
    x = jax.random.normal(xk, (n, channel_list[0]), jnp.float32)
    params = init_mlp_params(pk, channel_list)

    # 1) f32-operand path: tight check against the pure-JAX reference.
    out_f32 = jax.block_until_ready(mlp_forward(x, params, matmul_dtype=jnp.float32))
    ref_f32 = mlp_reference(x, params, matmul_dtype=jnp.float32)
    assert out_f32.shape == (n, channel_list[-1])
    assert jnp.allclose(out_f32, ref_f32, atol=1e-4, rtol=1e-4), "f32 path mismatch"

    # 2) Default bf16-MXU-operand path (fast path on v6e/v7x): check against
    #    a reference using the identical cast policy.
    out_bf16 = jax.block_until_ready(mlp_forward(x, params, matmul_dtype=jnp.bfloat16))
    ref_bf16 = mlp_reference(x, params, matmul_dtype=jnp.bfloat16)
    assert out_bf16.shape == (n, channel_list[-1])
    assert jnp.allclose(out_bf16, ref_bf16, atol=3e-2, rtol=3e-2), "bf16 path mismatch"

    print("KERNEL_OK")
</pallas_src>

<mosaic_0001>
module attributes {stable_mosaic.version = 11 : i64} {
  func.func @kernel(%arg0: memref<8x16xf32, #tpu.memory_space<vmem>>, %arg1: memref<16x32xf32, #tpu.memory_space<vmem>>, %arg2: memref<1x32xf32, #tpu.memory_space<vmem>>, %arg3: memref<1x32xf32, #tpu.memory_space<vmem>>, %arg4: memref<1x32xf32, #tpu.memory_space<vmem>>, %arg5: memref<32x32xf32, #tpu.memory_space<vmem>>, %arg6: memref<1x32xf32, #tpu.memory_space<vmem>>, %arg7: memref<1x32xf32, #tpu.memory_space<vmem>>, %arg8: memref<1x32xf32, #tpu.memory_space<vmem>>, %arg9: memref<32x64xf32, #tpu.memory_space<vmem>>, %arg10: memref<1x64xf32, #tpu.memory_space<vmem>>, %arg11: memref<8x64xf32, #tpu.memory_space<vmem>>) attributes {dimension_semantics = [], scalar_prefetch = 0 : i64, scratch_operands = 0 : i64, tpu.core_type = #tpu.core_type<tc>} {
    %c0 = arith.constant 0 : index
    %c0_0 = arith.constant 0 : index
    %0 = vector.load %arg0[%c0, %c0_0] : memref<8x16xf32, #tpu.memory_space<vmem>>, vector<8x16xf32>
    %c0_1 = arith.constant 0 : index
    %c0_2 = arith.constant 0 : index
    %1 = vector.load %arg1[%c0_1, %c0_2] : memref<16x32xf32, #tpu.memory_space<vmem>>, vector<16x32xf32>
    %cst = arith.constant dense<0.000000e+00> : vector<8x32xf32>
    %2 = tpu.matmul %0, %1, %cst {dimension_numbers = #tpu.dot_dimension_numbers<[1], [0], [0], [1], [0, 0, 1, 1], [], []>} : vector<8x16xf32>, vector<16x32xf32>, vector<8x32xf32> -> vector<8x32xf32>
    %c0_3 = arith.constant 0 : index
    %c0_4 = arith.constant 0 : index
    %3 = vector.load %arg2[%c0_3, %c0_4] : memref<1x32xf32, #tpu.memory_space<vmem>>, vector<1x32xf32>
    %4 = vector.broadcast %3 : vector<1x32xf32> to vector<8x32xf32>
    %5 = arith.addf %2, %4 : vector<8x32xf32>
    %cst_5 = arith.constant dense<0.000000e+00> : vector<32xf32>
    %6 = vector.multi_reduction <add>, %5, %cst_5 [0] : vector<8x32xf32> to vector<32xf32>
    %7 = vector.shape_cast %6 : vector<32xf32> to vector<1x32xf32>
    %cst_6 = arith.constant 8.000000e+00 : f32
    %8 = vector.broadcast %cst_6 : f32 to vector<1x32xf32>
    %9 = arith.divf %7, %8 : vector<1x32xf32>
    %10 = arith.mulf %5, %5 : vector<8x32xf32>
    %cst_7 = arith.constant dense<0.000000e+00> : vector<32xf32>
    %11 = vector.multi_reduction <add>, %10, %cst_7 [0] : vector<8x32xf32> to vector<32xf32>
    %12 = vector.shape_cast %11 : vector<32xf32> to vector<1x32xf32>
    %cst_8 = arith.constant 8.000000e+00 : f32
    %13 = vector.broadcast %cst_8 : f32 to vector<1x32xf32>
    %14 = arith.divf %12, %13 : vector<1x32xf32>
    %15 = arith.mulf %9, %9 : vector<1x32xf32>
    %16 = arith.subf %14, %15 : vector<1x32xf32>
    %cst_9 = arith.constant 0.000000e+00 : f32
    %17 = vector.broadcast %cst_9 : f32 to vector<1x32xf32>
    %18 = arith.maximumf %16, %17 : vector<1x32xf32>
    %c0_10 = arith.constant 0 : index
    %c0_11 = arith.constant 0 : index
    %19 = vector.load %arg3[%c0_10, %c0_11] : memref<1x32xf32, #tpu.memory_space<vmem>>, vector<1x32xf32>
    %cst_12 = arith.constant 9.99999974E-6 : f32
    %20 = vector.broadcast %cst_12 : f32 to vector<1x32xf32>
    %21 = arith.addf %18, %20 : vector<1x32xf32>
    %22 = math.rsqrt %21 : vector<1x32xf32>
    %23 = arith.mulf %19, %22 : vector<1x32xf32>
    %c0_13 = arith.constant 0 : index
    %c0_14 = arith.constant 0 : index
    %24 = vector.load %arg4[%c0_13, %c0_14] : memref<1x32xf32, #tpu.memory_space<vmem>>, vector<1x32xf32>
    %25 = arith.mulf %9, %23 : vector<1x32xf32>
    %26 = arith.subf %24, %25 : vector<1x32xf32>
    %27 = vector.broadcast %23 : vector<1x32xf32> to vector<8x32xf32>
    %28 = arith.mulf %5, %27 : vector<8x32xf32>
    %29 = vector.broadcast %26 : vector<1x32xf32> to vector<8x32xf32>
    %30 = arith.addf %28, %29 : vector<8x32xf32>
    %cst_15 = arith.constant 0.000000e+00 : f32
    %31 = vector.broadcast %cst_15 : f32 to vector<8x32xf32>
    %32 = arith.maximumf %30, %31 : vector<8x32xf32>
    %c0_16 = arith.constant 0 : index
    %c0_17 = arith.constant 0 : index
    %33 = vector.load %arg5[%c0_16, %c0_17] : memref<32x32xf32, #tpu.memory_space<vmem>>, vector<32x32xf32>
    %cst_18 = arith.constant dense<0.000000e+00> : vector<8x32xf32>
    %34 = tpu.matmul %32, %33, %cst_18 {dimension_numbers = #tpu.dot_dimension_numbers<[1], [0], [0], [1], [0, 0, 1, 1], [], []>} : vector<8x32xf32>, vector<32x32xf32>, vector<8x32xf32> -> vector<8x32xf32>
    %c0_19 = arith.constant 0 : index
    %c0_20 = arith.constant 0 : index
    %35 = vector.load %arg6[%c0_19, %c0_20] : memref<1x32xf32, #tpu.memory_space<vmem>>, vector<1x32xf32>
    %36 = vector.broadcast %35 : vector<1x32xf32> to vector<8x32xf32>
    %37 = arith.addf %34, %36 : vector<8x32xf32>
    %cst_21 = arith.constant dense<0.000000e+00> : vector<32xf32>
    %38 = vector.multi_reduction <add>, %37, %cst_21 [0] : vector<8x32xf32> to vector<32xf32>
    %39 = vector.shape_cast %38 : vector<32xf32> to vector<1x32xf32>
    %cst_22 = arith.constant 8.000000e+00 : f32
    %40 = vector.broadcast %cst_22 : f32 to vector<1x32xf32>
    %41 = arith.divf %39, %40 : vector<1x32xf32>
    %42 = arith.mulf %37, %37 : vector<8x32xf32>
    %cst_23 = arith.constant dense<0.000000e+00> : vector<32xf32>
    %43 = vector.multi_reduction <add>, %42, %cst_23 [0] : vector<8x32xf32> to vector<32xf32>
    %44 = vector.shape_cast %43 : vector<32xf32> to vector<1x32xf32>
    %cst_24 = arith.constant 8.000000e+00 : f32
    %45 = vector.broadcast %cst_24 : f32 to vector<1x32xf32>
    %46 = arith.divf %44, %45 : vector<1x32xf32>
    %47 = arith.mulf %41, %41 : vector<1x32xf32>
    %48 = arith.subf %46, %47 : vector<1x32xf32>
    %cst_25 = arith.constant 0.000000e+00 : f32
    %49 = vector.broadcast %cst_25 : f32 to vector<1x32xf32>
    %50 = arith.maximumf %48, %49 : vector<1x32xf32>
    %c0_26 = arith.constant 0 : index
    %c0_27 = arith.constant 0 : index
    %51 = vector.load %arg7[%c0_26, %c0_27] : memref<1x32xf32, #tpu.memory_space<vmem>>, vector<1x32xf32>
    %cst_28 = arith.constant 9.99999974E-6 : f32
    %52 = vector.broadcast %cst_28 : f32 to vector<1x32xf32>
    %53 = arith.addf %50, %52 : vector<1x32xf32>
    %54 = math.rsqrt %53 : vector<1x32xf32>
    %55 = arith.mulf %51, %54 : vector<1x32xf32>
    %c0_29 = arith.constant 0 : index
    %c0_30 = arith.constant 0 : index
    %56 = vector.load %arg8[%c0_29, %c0_30] : memref<1x32xf32, #tpu.memory_space<vmem>>, vector<1x32xf32>
    %57 = arith.mulf %41, %55 : vector<1x32xf32>
    %58 = arith.subf %56, %57 : vector<1x32xf32>
    %59 = vector.broadcast %55 : vector<1x32xf32> to vector<8x32xf32>
    %60 = arith.mulf %37, %59 : vector<8x32xf32>
    %61 = vector.broadcast %58 : vector<1x32xf32> to vector<8x32xf32>
    %62 = arith.addf %60, %61 : vector<8x32xf32>
    %cst_31 = arith.constant 0.000000e+00 : f32
    %63 = vector.broadcast %cst_31 : f32 to vector<8x32xf32>
    %64 = arith.maximumf %62, %63 : vector<8x32xf32>
    %c0_32 = arith.constant 0 : index
    %c0_33 = arith.constant 0 : index
    %65 = vector.load %arg9[%c0_32, %c0_33] : memref<32x64xf32, #tpu.memory_space<vmem>>, vector<32x64xf32>
    %cst_34 = arith.constant dense<0.000000e+00> : vector<8x64xf32>
    %66 = tpu.matmul %64, %65, %cst_34 {dimension_numbers = #tpu.dot_dimension_numbers<[1], [0], [0], [1], [0, 0, 1, 1], [], []>} : vector<8x32xf32>, vector<32x64xf32>, vector<8x64xf32> -> vector<8x64xf32>
    %c0_35 = arith.constant 0 : index
    %c0_36 = arith.constant 0 : index
    %67 = vector.load %arg10[%c0_35, %c0_36] : memref<1x64xf32, #tpu.memory_space<vmem>>, vector<1x64xf32>
    %68 = vector.broadcast %67 : vector<1x64xf32> to vector<8x64xf32>
    %69 = arith.addf %66, %68 : vector<8x64xf32>
    %c0_37 = arith.constant 0 : index
    %c0_38 = arith.constant 0 : index
    %70 = vector.load %arg11[%c0_37, %c0_38] : memref<8x64xf32, #tpu.memory_space<vmem>>, vector<8x64xf32>
    tpu.vector_store %arg11[%c0_37, %c0_38], %69 {strides = array<i32>} : memref<8x64xf32, #tpu.memory_space<vmem>>, vector<8x64xf32>,
    return
  }
}

</mosaic_0001>

<bundles_post_ra>
// kernel: mlp_forward.1
= control target key start
LH: loop header
LB: loop body
LE: loop exit
PB: predicated region body
PF: predicated region fallthrough
CT: control target
= control target key end

     0   :  { %16 = vsyncpa [#allocation3], 0  ;;  %s751_s0 = inlined_call_operand.hbm [shape: f32[8,16], index: 0, kind: input, shape index: {}]   ;;  %s752_s1 = inlined_call_operand.hbm [shape: f32[16,32], index: 1, kind: input, shape index: {}]   ;;  %s753_s2 = inlined_call_operand.vmem [shape: f32[1,32], index: 2, kind: input, shape index: {}]   ;;  %s754_s3 = inlined_call_operand.vmem [shape: f32[1,32], index: 3, kind: input, shape index: {}]   ;;  %s755_s4 = inlined_call_operand.vmem [shape: f32[1,32], index: 4, kind: input, shape index: {}]   ;;  %s756_s5 = inlined_call_operand.hbm [shape: f32[32,32], index: 5, kind: input, shape index: {}]   ;;  %s757_s6 = inlined_call_operand.vmem [shape: f32[1,32], index: 6, kind: input, shape index: {}]   ;;  %s758_s7 = inlined_call_operand.vmem [shape: f32[1,32], index: 7, kind: input, shape index: {}]   ;;  %s759_s8 = inlined_call_operand.vmem [shape: f32[1,32], index: 8, kind: input, shape index: {}]   ;;  %s760_s9 = inlined_call_operand.hbm [shape: f32[32,64], index: 9, kind: input, shape index: {}]   ;;  %s761_s10 = inlined_call_operand.vmem [shape: f32[1,64], index: 10, kind: input, shape index: {}]   ;;  %s762_s11 = inlined_call_operand.hbm [shape: f32[8,64], index: 11, kind: output, shape index: {}]  }
   0x1   :  { %17 = vsyncpa [#allocation6], 0 }
   0x2   :  { %18 = vsyncpa [#allocation9], 0 }
   0x3   :  { %19 = vsyncpa [#allocation4], 0  ;;  %s618_s17 = smov [#allocation5]  }
   0x4   :  { %s35_s18 = sshll.u32 %s618_s17, 4  ;;  %s36_s18 = int_to_ptr.vmem [resolvable:$true] %s35_s18 }
   0x5   :  { %s518_s19 = scalar_lea.vmem %s36_s18, 256  ;;  %p523_p1 = scmp.lt.s32.totalorder %s36_s18, %s36_s18 }
   0x6   :  { %p519_p0 = scmp.ne.s32.totalorder %s36_s18, %s518_s19  ;;  %p524_p2 = scmp.lt.s32.totalorder %s518_s19, %s518_s19 }
   0x8   :  { %p525_p3 = por %p524_p2, %p523_p1 }
   0xa   :  { %p526_p4 = pnand %p525_p3, %p519_p0 }
   0xc   :  { %529 = shalt.err (!%p526_p4)
}
   0xd   :  { %s619_s20 = smov 128   ;;  %s620_s21 = smov 8  }
   0xe   :  { %41 = dma.hbm_to_vmem [thread:$0]  %s752_s1, 256, %s36_s18, [#allocation6], %s619_s20, %s619_s20, %s620_s21  }
   0xf   :  { %s621_s24 = smov [#allocation2]   ;;  %s622_s26 = smov [#allocation7]  }
  0x10   :  { %s26_s25 = sshll.u32 %s621_s24, 4  ;;  %s53_s27 = sshll.u32 %s622_s26, 4  ;;  %s27_s25 = int_to_ptr.vmem [resolvable:$true] %s26_s25  ;;  %s54_s27 = int_to_ptr.vmem [resolvable:$true] %s53_s27 }
  0x11   :  { %s538_s28 = scalar_lea.vmem %s27_s25, 128  ;;  %p543_p6 = scmp.lt.s32.totalorder %s27_s25, %s27_s25 }
  0x12   :  { %p539_p5 = scmp.ne.s32.totalorder %s27_s25, %s538_s28  ;;  %p544_p7 = scmp.lt.s32.totalorder %s538_s28, %s538_s28 }
  0x14   :  { %p545_p8 = por %p544_p7, %p543_p6 }
  0x16   :  { %p546_p9 = pnand %p545_p8, %p539_p5 }
  0x18   :  { %549 = shalt.err (!%p546_p9)
}
  0x19   :  { %29 = dma.hbm_to_vmem [thread:$0]  %s751_s0, 128, %s27_s25, [#allocation3]  }
  0x1a   :  { %s558_s12 = scalar_lea.vmem %s54_s27, 512  ;;  %p563_p11 = scmp.lt.s32.totalorder %s54_s27, %s54_s27 }
  0x1b   :  { %p559_p10 = scmp.ne.s32.totalorder %s54_s27, %s558_s12  ;;  %p564_p12 = scmp.lt.s32.totalorder %s558_s12, %s558_s12 }
  0x1d   :  { %p565_p13 = por %p564_p12, %p563_p11 }
  0x1f   :  { %p566_p0 = pnand %p565_p13, %p559_p10 }
  0x21   :  { %569 = shalt.err (!%p566_p0)
}
  0x22   :  { %59 = dma.hbm_to_vmem [thread:$0]  %s756_s5, 512, %s54_s27, [#allocation6], %s619_s20, %s619_s20, %s620_s21  }
  0x23   :  { %s623_s14 = smov [#allocation8]  }
  0x24   :  { %s71_s15 = sshll.u32 %s623_s14, 4  ;;  %s72_s15 = int_to_ptr.vmem [resolvable:$true] %s71_s15 }
  0x25   :  { %s578_s16 = scalar_lea.vmem %s72_s15, 512  ;;  %p583_p2 = scmp.lt.s32.totalorder %s72_s15, %s72_s15 }
  0x26   :  { %p579_p1 = scmp.ne.s32.totalorder %s72_s15, %s578_s16  ;;  %p584_p3 = scmp.lt.s32.totalorder %s578_s16, %s578_s16 }
  0x28   :  { %p585_p4 = por %p584_p3, %p583_p2 }
  0x2a   :  { %p586_p5 = pnand %p585_p4, %p579_p1 }
  0x2c   :  { %589 = shalt.err (!%p586_p5)
}
  0x2d   :  { %77 = dma.hbm_to_vmem [thread:$0]  %s760_s9, 512, %s72_s15, [#allocation9], %s619_s20, %s619_s20, %s620_s21  }
  0x2e   :  { %610 = dma.done.wait [#allocation3], 128  }
  0x2f   :  { %611 = vsyncadd [#allocation3], 4294967168 }
  0x30   :  { %612 = dma.done.wait [#allocation6], 768  }
  0x31   :  { %613 = vsyncadd [#allocation6], 4294966528 }
  0x32   :  { %614 = dma.done.wait [#allocation9], 512  }
  0x33   :  { %615 = vsyncadd [#allocation9], 4294966784  ;;  %v624_v0 = vmov 0.0   ;;  %vm625_vm0 = vmmov 0   ;;  %v94_v1 = vld [vmem:[#allocation5 + $0x8] sm:$0xff]  ;;  %v93_v2 = vld [vmem:[#allocation5] sm:$0xff]  ;;  %v206_v33 = vlaneseq }
  0x34   :  { %468 = vmatprep.subr.mxu0 %v624_v0  ;;  %472 = vmatprep.mubr.msk.f32.mxu0 %vm625_vm0, %v624_v0  ;;  %v92_v3 = vld [vmem:[#allocation2] sm:$0xff]  ;;  %vm102_vm1 = vcmask 130048   ;;  %v223_v4 = vld [vmem:[#allocation7 + $0x18] sm:$0xff]  ;;  %v222_v5 = vld [vmem:[#allocation7 + $0x10] sm:$0xff]  ;;  %vm176_vm2 = vcmask 261120   ;;  %vm430_vm3 = vcmask 523264  }
  0x35   :  { %475 = vmatprep.subr.mxu1 %v624_v0  ;;  %483 = vmatprep.mubr.msk.f32.mxu1 %vm625_vm0, %v624_v0  ;;  %v221_v6 = vld [vmem:[#allocation7 + $0x8] sm:$0xff]  ;;  %v220_v7 = vld [vmem:[#allocation7] sm:$0xff]  ;;  %v207_v34 = vshrl.u32 %v206_v33, 7  ;;  %v349_v47 = vld [vmem:[#allocation8 + $0x18] sm:$0xff] }
  0x36   :  { %469 = vmatpush3.msra.mxu0 %v94_v1  ;;  %476 = vmatpush3.msra.mxu1 %v223_v4  ;;  %v449_v8 = vld [vmem:[%s753_s2] ss:$0 sm:$0xff]  ;;  %v348_v48 = vld [vmem:[#allocation8 + $0x10] sm:$0xff]  ;;  %v346_v50 = vld [vmem:[#allocation8] sm:$0xff] }
  0x37   :  { %470 = vmatprep.subr.mxu0 %v624_v0  ;;  %477 = vmatprep.subr.mxu1 %v624_v0  ;;  %v198_v35 = vld [vmem:[%s754_s3] sm:$0x1]  ;;  %v208_v36 = vsub.s32 0, %v207_v34 }
  0x38   :  { %471 = vmatpush3.msra.mxu0 %v93_v2  ;;  %478 = vmatpush3.msra.mxu1 %v222_v5  ;;  %v202_v39 = vld [vmem:[%s755_s4] sm:$0x1] }
  0x39   :  { %473 = vmatmul.mubr.msk.f32.vlgmr.msra.gmra.mxu0 %vm102_vm1, %v92_v3  ;;  %486 = vmatprep.subr.mxu0 %v624_v0  ;;  %v347_v49 = vld [vmem:[#allocation8 + $0x8] sm:$0xff] }
  0x3a   :  { %494 = vmatprep.mubr.msk.f32.mxu0 %vm625_vm0, %v624_v0  ;;  %479 = vmatprep.subr.mxu1 %v624_v0  ;;  %v451_v51 = vld [vmem:[%s757_s6] ss:$0 sm:$0xff] }
  0x3b   :  { %480 = vmatpush3.msra.mxu1 %v221_v6  ;;  %487 = vmatpush3.msra.mxu0 %v349_v47 }
  0x3c   :  { %481 = vmatprep.subr.mxu1 %v624_v0  ;;  %488 = vmatprep.subr.mxu0 %v624_v0 }
  0x3d   :  { %482 = vmatpush3.msra.mxu1 %v220_v7  ;;  %489 = vmatpush3.msra.mxu0 %v348_v48 }
  0x3e   :  { %490 = vmatprep.subr.mxu0 %v624_v0 }
  0x3f   :  { %491 = vmatpush3.msra.mxu0 %v347_v49 }
  0x40   :  { %492 = vmatprep.subr.mxu0 %v624_v0 }
  0x41   :  { %493 = vmatpush3.msra.mxu0 %v346_v50 }
  0xf9   :  { %v172_v9 = vpop.f32.mrf.mxu0 }
  0xfa   :  { %v173_v10 = vadd.f32 %v449_v8, %v172_v9 }
  0xfb   :  { %v474_v11 = vpop.f32.mrf.mxu0 }
  0xfc   :  { %v177_v12 = vsel %vm176_vm2, %v173_v10, 0.0  ;;  %v186_v13 = vmul.f32 %v173_v10, %v173_v10 }
  0xfd   :  { %v178_v14 = vrot.slane %v177_v12, 4 }
  0xfe   :  { %v187_v15 = vsel %vm176_vm2, %v186_v13, 0.0 }
  0xff   :  { %v179_v16 = vadd.f32 %v178_v14, %v177_v12  ;;  %v188_v17 = vrot.slane %v187_v15, 4  ;;  %v324_v12 = vld [vmem:[%s758_s7] sm:$0x1]  ;;  %s626_s7 = smov [#allocation10]  }
 0x100   :  { %s438_s26 = sshll.u32 %s626_s7, 4  ;;  %s439_s26 = int_to_ptr.vmem [resolvable:$true] %s438_s26 }
 0x101   :  { %v180_v18 = vrot.slane %v179_v16, 2  ;;  %v189_v19 = vadd.f32 %v188_v17, %v187_v15  ;;  %v328_v15 = vld [vmem:[%s759_s8] sm:$0x1]  ;;  %s590_s8 = scalar_lea.vmem %s439_s26, 128  ;;  %p595_p7 = scmp.lt.s32.totalorder %s439_s26, %s439_s26 }
 0x102   :  { %p591_p6 = scmp.ne.s32.totalorder %s439_s26, %s590_s8  ;;  %p596_p8 = scmp.lt.s32.totalorder %s590_s8, %s590_s8 }
 0x103   :  { %v181_v20 = vadd.f32 %v180_v18, %v179_v16  ;;  %v190_v21 = vrot.slane %v189_v19, 2 }
 0x104   :  { %p597_p9 = por %p596_p8, %p595_p7 }
 0x105   :  { %v182_v22 = vrot.slane %v181_v20, 1  ;;  %v191_v23 = vadd.f32 %v190_v21, %v189_v19 }
 0x106   :  { %p598_p10 = pnand %p597_p9, %p591_p6 }
 0x107   :  { %v183_v24 = vadd.f32 %v182_v22, %v181_v20  ;;  %v192_v25 = vrot.slane %v191_v23, 1 }
 0x109   :  { %v185_v26 = vmul.f32 0.125, %v183_v24  ;;  %v193_v27 = vadd.f32 %v192_v25, %v191_v23  ;;  %v453_v23 = vld [vmem:[%s761_s10] ss:$0 sm:$0xff] }
 0x10b   :  { %v194_v28 = vmul.f32 0.125, %v193_v27  ;;  %v195_v29 = vmul.f32 %v185_v26, %v185_v26 }
 0x10d   :  { %v196_v30 = vsub.f32 %v194_v28, %v195_v29 }
 0x10f   :  { %v197_v31 = vmax.f32 %v196_v30, 0.0 }
 0x111   :  { %v199_v32 = vadd.f32 1e-05, %v197_v31 }
 0x113   :  { %506 = vrsqrt.f32 %v199_v32 }
 0x120   :  { %v507_v37 = vpop.eup %506 }
 0x121   :  { %v201_v38 = vmul.f32 %v507_v37, %v198_v35 }
 0x123   :  { %v203_v40 = vmul.f32 %v201_v38, %v185_v26  ;;  %v209_v41 = vrot.slane %v201_v38, %v208_v36 }
 0x125   :  { %v204_v42 = vsub.f32 %v202_v39, %v203_v40  ;;  %v211_v43 = vmul.f32 %v209_v41, %v173_v10 }
 0x127   :  { %v216_v44 = vrot.slane %v204_v42, %v208_v36 }
 0x129   :  { %v218_v45 = vadd.f32 %v216_v44, %v211_v43 }
 0x12b   :  { %v219_v46 = vmax.f32 %v218_v45, 0.0 }
 0x12d   :  { %484 = vmatmul.mubr.msk.f32.vlgmr.msra.gmra.mxu1 %vm176_vm2, %v219_v46 }
 0x1ed   :  { %v300_v52 = vpop.f32.mrf.mxu1 }
 0x1ee   :  { %v301_v53 = vadd.f32 %v451_v51, %v300_v52 }
 0x1ef   :  { %v485_v54 = vpop.f32.mrf.mxu1 }
 0x1f0   :  { %v304_v55 = vsel %vm176_vm2, %v301_v53, 0.0  ;;  %v312_v56 = vmul.f32 %v301_v53, %v301_v53 }
 0x1f1   :  { %v305_v57 = vrot.slane %v304_v55, 4 }
 0x1f2   :  { %v313_v58 = vsel %vm176_vm2, %v312_v56, 0.0 }
 0x1f3   :  { %v306_v59 = vadd.f32 %v305_v57, %v304_v55  ;;  %v314_v60 = vrot.slane %v313_v58, 4 }
 0x1f5   :  { %v307_v61 = vrot.slane %v306_v59, 2  ;;  %v315_v62 = vadd.f32 %v314_v60, %v313_v58 }
 0x1f7   :  { %v308_v63 = vadd.f32 %v307_v61, %v306_v59  ;;  %v316_v0 = vrot.slane %v315_v62, 2 }
 0x1f9   :  { %v309_v1 = vrot.slane %v308_v63, 1  ;;  %v317_v2 = vadd.f32 %v316_v0, %v315_v62 }
 0x1fb   :  { %v310_v3 = vadd.f32 %v309_v1, %v308_v63  ;;  %v318_v4 = vrot.slane %v317_v2, 1 }
 0x1fd   :  { %v311_v5 = vmul.f32 0.125, %v310_v3  ;;  %v319_v6 = vadd.f32 %v318_v4, %v317_v2 }
 0x1ff   :  { %v320_v7 = vmul.f32 0.125, %v319_v6  ;;  %v321_v8 = vmul.f32 %v311_v5, %v311_v5 }
 0x201   :  { %v322_v9 = vsub.f32 %v320_v7, %v321_v8 }
 0x203   :  { %v323_v10 = vmax.f32 %v322_v9, 0.0 }
 0x205   :  { %v325_v11 = vadd.f32 1e-05, %v323_v10 }
 0x207   :  { %508 = vrsqrt.f32 %v325_v11 }
 0x214   :  { %v509_v13 = vpop.eup %508 }
 0x215   :  { %v327_v14 = vmul.f32 %v509_v13, %v324_v12 }
 0x217   :  { %v329_v16 = vmul.f32 %v327_v14, %v311_v5  ;;  %v335_v17 = vrot.slane %v327_v14, %v208_v36 }
 0x219   :  { %v330_v18 = vsub.f32 %v328_v15, %v329_v16  ;;  %v337_v19 = vmul.f32 %v335_v17, %v301_v53 }
 0x21b   :  { %v342_v20 = vrot.slane %v330_v18, %v208_v36 }
 0x21d   :  { %v344_v21 = vadd.f32 %v342_v20, %v337_v19 }
 0x21f   :  { %v345_v22 = vmax.f32 %v344_v21, 0.0 }
 0x221   :  { %495 = vmatmul.mubr.msk.f32.vlgmr.msra.gmra.mxu0 %vm176_vm2, %v345_v22 }
 0x2e1   :  { %v426_v24 = vpop.f32.mrf.mxu0 }
 0x2e2   :  { %v427_v25 = vadd.f32 %v453_v23, %v426_v24 }
 0x2e3   :  { %v496_v26 = vpop.f32.mrf.mxu0 }
 0x2e4   :  { %431 = vst.msk [vmem:[#allocation10] sm:$0xff] %vm430_vm3, %v427_v25 }
 0x2e5   :  { %601 = shalt.err (!%p598_p10)
}
 0x2e6   :  { %441 = dma.vmem_to_hbm [thread:$0]  %s439_s26, 128, %s762_s11, [#allocation4]  }
 0x2e7   :  { %616 = dma.done.wait [#allocation4], 128  }
 0x2e8   :  { %617 = vsyncadd [#allocation4], 4294967168 }
 0x2e9   :  { %445 = vsyncpa [#allocation3], 1 }
 0x2ea   :  { %446 = vsyncpa [#allocation6], 1 }
 0x2eb   :  { %447 = vsyncpa [#allocation9], 1 }
 0x2ec   :  { %448 = vsyncpa [#allocation4], 1 }

</bundles_post_ra>
